<compile_context>
chip_gen: v7x
topology: tpu7x:2x2x1
jax: 0.10.0
libtpu: 0.0.40
codegen_flags: <defaults>
</compile_context>

<pallas_src>
import jax
import jax.numpy as jnp
from jax.experimental import pallas as pl
from jax.experimental.pallas import tpu as pltpu


def _round_up(x, m):
    return ((x + m - 1) // m) * m


def layer_choice_kernel(sel_ref, patches_ref, w_ref, b_ref, out_ref):
    # sel_ref     : (1,) int32 in SMEM -- used only by the index_maps.
    # patches_ref : (kd, tm)     bf16  -- im2col patches, pixels on lanes.
    # w_ref       : (c_out, kd)  bf16  -- SELECTED candidate's weight matrix
    #                                     (gate already folded in).
    # b_ref       : (c_out, 1)   f32   -- SELECTED candidate's bias.
    # out_ref     : (c_out, tm)  f32
    del sel_ref
    y = jnp.dot(w_ref[...], patches_ref[...],
                preferred_element_type=jnp.float32)
    out_ref[...] = y + b_ref[...]


def layer_choice_forward(x_nchw, weights, biases, mask, *, tm=1024):
    """out = sum_k mask[k] * conv3x3_k(x)  with a one-hot mask (LayerChoice).

    x_nchw : (N, C, H, W) float32
    weights: (num_cands, C_out, C_in, 3, 3) float32   (PyTorch OIHW per candidate)
    biases : (num_cands, C_out) float32
    mask   : (num_cands,) int32 one-hot decision from the mutator
    """
    num_cands, c_out, c_in, kh, kw = weights.shape
    n, c, h, w = x_nchw.shape
    assert c == c_in
    pad = kh // 2
    kd = kh * kw * c_in
    hw = h * w

    # "Mutator" decision: single active candidate + its gate value.
    sel = jnp.argmax(mask).astype(jnp.int32).reshape(1)
    gate = jnp.max(mask).astype(jnp.float32)   # == 1 for a strict one-hot mask

    # ---- glue (plain JAX): im2col in transposed orientation (N, kd, H*W),
    # channels/taps on sublanes, pixels on lanes.  Built directly from NCHW so
    # no NCHW<->NHWC transposes are needed anywhere.
    xp = jnp.pad(x_nchw, ((0, 0), (0, 0), (pad, pad), (pad, pad)))
    cols = [xp[:, :, di:di + h, dj:dj + w]
            for di in range(kh) for dj in range(kw)]
    patches = jnp.concatenate(cols, axis=1).reshape(n, kd, hw).astype(jnp.bfloat16)

    # weights -> (num_cands, c_out, kd) with kd ordered (di, dj, c_in) to match
    # the patch rows; fold the scalar gate into the tiny weight/bias arrays.
    w_t = jnp.transpose(weights, (0, 1, 3, 4, 2)).reshape(num_cands, c_out, kd)
    w_t = (gate * w_t).astype(jnp.bfloat16)
    b_t = (gate * biases).astype(jnp.float32).reshape(num_cands, c_out, 1)

    # ---- lane tiling of the per-sample pixel axis, padded to a tile multiple.
    tm_eff = min(tm, _round_up(hw, 128))
    hw_pad = pl.cdiv(hw, tm_eff) * tm_eff
    if hw_pad != hw:
        patches = jnp.pad(patches, ((0, 0), (0, 0), (0, hw_pad - hw)))

    grid = (n, hw_pad // tm_eff)

    # VMEM budget: double-buffered patch/output blocks + the selected weights.
    # Capped at 48 MiB so the tiling is also safe on v7x (64 MiB physical).
    blk_bytes = (tm_eff * kd * 2) + (tm_eff * c_out * 4) + (c_out * kd * 2) + (c_out * 4)
    vmem_limit = int(min(max(4 * blk_bytes, 16 * 2**20), 48 * 2**20))

    out_flat = pl.pallas_call(
        layer_choice_kernel,
        out_shape=jax.ShapeDtypeStruct((n, c_out, hw_pad), jnp.float32),
        grid_spec=pltpu.PrefetchScalarGridSpec(
            num_scalar_prefetch=1,          # sel -> SMEM (for index maps)
            grid=grid,
            in_specs=[
                # patches: tiled over (sample, pixel-tile)
                pl.BlockSpec((pl.Squeezed(), kd, tm_eff),
                             lambda i, m, sel: (i, 0, m)),
                # weights: data-dependent candidate selection (constant across
                # the grid, so Pallas DMAs it once and keeps it resident).
                pl.BlockSpec((pl.Squeezed(), c_out, kd),
                             lambda i, m, sel: (sel[0], 0, 0)),
                # bias: same selection
                pl.BlockSpec((pl.Squeezed(), c_out, 1),
                             lambda i, m, sel: (sel[0], 0, 0)),
            ],
            out_specs=pl.BlockSpec((pl.Squeezed(), c_out, tm_eff),
                                   lambda i, m, sel: (i, 0, m)),
        ),
        compiler_params=pltpu.CompilerParams(
            dimension_semantics=("parallel", "parallel"),
            vmem_limit_bytes=vmem_limit),
    )(sel, patches, w_t, b_t)

    # Padded pixel lanes hold bias garbage -> slice off, then plain reshape to
    # NCHW (output already comes out channel-major per sample; no transpose).
    if hw_pad != hw:
        out_flat = out_flat[:, :, :hw]
    return out_flat.reshape(n, c_out, h, w)


def _reference_forward(x, weights, biases, mask):
    outs = 0.0
    for kk in range(weights.shape[0]):
        y = jax.lax.conv_general_dilated(
            x, weights[kk], window_strides=(1, 1), padding="SAME",
            dimension_numbers=("NCHW", "OIHW", "NCHW"))
        y = y + biases[kk][None, :, None, None]
        outs = outs + mask[kk].astype(jnp.float32) * y
    return outs


if __name__ == "__main__":
    key = jax.random.PRNGKey(0)
    k_x, k_w, k_b = jax.random.split(key, 3)

    N, C, H, W = 2, 4, 16, 16
    NUM_CANDS, KH, KW = 3, 3, 3

    x = jax.random.normal(k_x, (N, C, H, W), dtype=jnp.float32)
    weights = 0.1 * jax.random.normal(
        k_w, (NUM_CANDS, C, C, KH, KW), dtype=jnp.float32)
    biases = 0.1 * jax.random.normal(k_b, (NUM_CANDS, C), dtype=jnp.float32)
    # deterministic "mutator" decision: one-hot choice of candidate 1
    mask = jnp.array([0, 1, 0], dtype=jnp.int32)

    out = layer_choice_forward(x, weights, biases, mask)
    out = jax.block_until_ready(out)

    ref = _reference_forward(x, weights, biases, mask)
    assert out.shape == (N, C, H, W)
    # bf16 patches/weights with f32 accumulation -> loosened tolerance vs f32 ref
    assert jnp.allclose(out, ref, atol=2e-2, rtol=2e-2)

    print("KERNEL_OK")
</pallas_src>

<mosaic_0001>
module attributes {stable_mosaic.version = 11 : i64} {
  func.func @layer_choice_kernel(%arg0: i32, %arg1: i32, %arg2: memref<1xi32, #tpu.memory_space<smem>>, %arg3: memref<1x36x256xbf16, #tpu.memory_space<vmem>>, %arg4: memref<1x4x36xbf16, #tpu.memory_space<vmem>>, %arg5: memref<1x4x1xf32, #tpu.memory_space<vmem>>, %arg6: memref<1x4x256xf32, #tpu.memory_space<vmem>>) attributes {dimension_semantics = [#tpu.dimension_semantics<parallel>, #tpu.dimension_semantics<parallel>], iteration_bounds = array<i64: 2, 1>, scalar_prefetch = 1 : i64, scratch_operands = 0 : i64, tpu.core_type = #tpu.core_type<tc>, window_params = [{transform_indices = @transform_0, window_bounds = array<i64: 1, 36, 256>}, {transform_indices = @transform_1, window_bounds = array<i64: 1, 4, 36>}, {transform_indices = @transform_2, window_bounds = array<i64: 1, 4, 1>}, {transform_indices = @transform_3, window_bounds = array<i64: 1, 4, 256>}]} {
    %c0 = arith.constant 0 : index
    %c0_0 = arith.constant 0 : index
    %c0_1 = arith.constant 0 : index
    %0 = vector.load %arg4[%c0, %c0_0, %c0_1] : memref<1x4x36xbf16, #tpu.memory_space<vmem>>, vector<1x4x36xbf16>
    %1 = vector.shape_cast %0 : vector<1x4x36xbf16> to vector<4x36xbf16>
    %c0_2 = arith.constant 0 : index
    %c0_3 = arith.constant 0 : index
    %c0_4 = arith.constant 0 : index
    %2 = vector.load %arg3[%c0_2, %c0_3, %c0_4] : memref<1x36x256xbf16, #tpu.memory_space<vmem>>, vector<1x36x256xbf16>
    %3 = vector.shape_cast %2 : vector<1x36x256xbf16> to vector<36x256xbf16>
    %cst = arith.constant dense<0.000000e+00> : vector<4x256xf32>
    %4 = tpu.matmul %1, %3, %cst {dimension_numbers = #tpu.dot_dimension_numbers<[1], [0], [0], [1], [0, 0, 1, 1], [], []>} : vector<4x36xbf16>, vector<36x256xbf16>, vector<4x256xf32> -> vector<4x256xf32>
    %c0_5 = arith.constant 0 : index
    %c0_6 = arith.constant 0 : index
    %c0_7 = arith.constant 0 : index
    %5 = vector.load %arg5[%c0_5, %c0_6, %c0_7] : memref<1x4x1xf32, #tpu.memory_space<vmem>>, vector<1x4x1xf32>
    %6 = vector.shape_cast %5 : vector<1x4x1xf32> to vector<4x1xf32>
    %7 = vector.broadcast %6 : vector<4x1xf32> to vector<4x256xf32>
    %8 = arith.addf %4, %7 : vector<4x256xf32>
    %c0_8 = arith.constant 0 : index
    %c0_9 = arith.constant 0 : index
    %c0_10 = arith.constant 0 : index
    %9 = vector.load %arg6[%c0_8, %c0_9, %c0_10] : memref<1x4x256xf32, #tpu.memory_space<vmem>>, vector<1x4x256xf32>
    %10 = vector.shape_cast %9 : vector<1x4x256xf32> to vector<4x256xf32>
    %11 = vector.shape_cast %8 : vector<4x256xf32> to vector<1x4x256xf32>
    tpu.vector_store %arg6[%c0_8, %c0_9, %c0_10], %11 {strides = array<i32>} : memref<1x4x256xf32, #tpu.memory_space<vmem>>, vector<1x4x256xf32>,
    return
  }
  func.func @transform_0(%arg0: i32, %arg1: i32, %arg2: memref<1xi32, #tpu.memory_space<smem>>) -> (i32, i32, i32) {
    %c0_i32 = arith.constant 0 : i32
    %c0_i32_0 = arith.constant 0 : i32
    return %arg0, %c0_i32, %arg1 : i32, i32, i32
  }
  func.func @transform_1(%arg0: i32, %arg1: i32, %arg2: memref<1xi32, #tpu.memory_space<smem>>) -> (i32, i32, i32) {
    %c0 = arith.constant 0 : index
    %0 = memref.load %arg2[%c0] : memref<1xi32, #tpu.memory_space<smem>>
    %c0_i32 = arith.constant 0 : i32
    %c0_i32_0 = arith.constant 0 : i32
    %c0_i32_1 = arith.constant 0 : i32
    return %0, %c0_i32, %c0_i32_0 : i32, i32, i32
  }
  func.func @transform_2(%arg0: i32, %arg1: i32, %arg2: memref<1xi32, #tpu.memory_space<smem>>) -> (i32, i32, i32) {
    %c0 = arith.constant 0 : index
    %0 = memref.load %arg2[%c0] : memref<1xi32, #tpu.memory_space<smem>>
    %c0_i32 = arith.constant 0 : i32
    %c0_i32_0 = arith.constant 0 : i32
    %c0_i32_1 = arith.constant 0 : i32
    return %0, %c0_i32, %c0_i32_0 : i32, i32, i32
  }
  func.func @transform_3(%arg0: i32, %arg1: i32, %arg2: memref<1xi32, #tpu.memory_space<smem>>) -> (i32, i32, i32) {
    %c0_i32 = arith.constant 0 : i32
    %c0_i32_0 = arith.constant 0 : i32
    return %arg0, %c0_i32, %arg1 : i32, i32, i32
  }
}

</mosaic_0001>

<bundles_post_ra>
// kernel: tpu_custom_call.1
= control target key start
LH: loop header
LB: loop body
LE: loop exit
PB: predicated region body
PF: predicated region fallthrough
CT: control target
= control target key end

     0   :  { %s785_s0 = inlined_call_operand.<no memory space> [shape: s32[1], index: 0, kind: input, shape index: {}]   ;;  %s786_s1 = inlined_call_operand.vmem [shape: bf16[2,36,256], index: 1, kind: input, shape index: {}]   ;;  %s787_s2 = inlined_call_operand.vmem [shape: bf16[3,4,36], index: 2, kind: input, shape index: {}]   ;;  %s788_s3 = inlined_call_operand.vmem [shape: f32[3,4,1], index: 3, kind: input, shape index: {}]   ;;  %s789_s4 = inlined_call_operand.hbm [shape: f32[2,4,256], index: 4, kind: output, shape index: {}]  }
   0x1   :  { %9 = sst [smem:[#allocation3]] %s785_s0 }
   0x2   :  { %10 = vsyncpa [#allocation5], 0 }
   0x3   :  { %12 = vsyncpa [#allocation5 + $0x1], 0  ;;  %s667_s17 = smov 0   ;;  %s669_s18 = smov 0  }
   0x4   :  { %s671_s19 = smov 0   ;;  %s673_s20 = smov 0  }
   0x5   :  { %s675_s21 = smov 0   ;;  %s677_s22 = smov 0  }
   0x6 LB: > { %s468_s0 = sadd.s32 4294967295, %s635_s22   ;;  %s469_s23 = sadd.s32 4294967294, %s635_s22   ;;  %s635_s22 = sphi %s677_s22, %s18_s22   ;;  %s631_s21 = sphi %s675_s21, %s796_s21   ;;  %s627_s20 = sphi %s673_s20, %s795_s20   ;;  %s623_s19 = sphi %s671_s19, %s794_s19   ;;  %s619_s18 = sphi %s669_s18, %s793_s18   ;;  %s615_s17 = sphi %s667_s17, %s792_s17  }
   0x7   : > { %s30_s24 = sadd.s32 1, %s631_s21  ;;  %s123_s25 = sadd.s32 1, %s623_s19 }
   0x8   : > { %p32_p0 = scmp.ge.s32.totalorder %s30_s24, 2  ;;  %p133_p1 = scmp.ne.s32.totalorder %s623_s19, %s619_s18 }
   0x9   : > { %p134_p2 = scmp.eq.s32.totalorder %s468_s0, 1  ;;  %p139_p3 = scmp.ne.s32.totalorder %s619_s18, %s615_s17 }
   0xa   : > { %s798_s24 = smov (%p32_p0, %s30_s24), 0  ;;  %p140_p5 = scmp.eq.s32.totalorder %s469_s23, 1 }
   0xb   : > { %p707_p4 = por %p134_p2, %p133_p1  ;;  %s118_s27 = ssub.s32 %s631_s21, %s798_s24 }
   0xc   : > { %p472_p6 = scmp.ge.s32.totalorder %s635_s22, 1  ;;  %p121_p7 = scmp.eq.s32.totalorder %s118_s27, 0 }
   0xd   : > { %p714_p8 = por %p140_p5, %p139_p3  ;;  %p189_p9 = scmp.lt.s32.totalorder %s635_s22, 3 }
   0xe   : > { %s720_s29 = scalar_select %p121_p7, %s623_s19, %s123_s25  }
   0xf   : > { %p190_p10 = pnand %p472_p6, %p189_p9 }
  0x10   : > { %p228_p11 = scmp.lt.s32.totalorder (!%p190_p10), %s627_s20, 1  ;;  %s237_s30 = sld [smem:[#allocation3]] (!%p190_p10)  ;;  %v637_v0 = vmov (!%p190_p10), 0   ;;  %vm292_vm0 = vcmask (!%p190_p10), 1041408   ;;  %vm288_vm1 = vcmask (!%p190_p10), 293888  }
  0x11   : > { %193 = sbr.rel (%p190_p10) target bundleno = 273 (0x111), region = 32  ;;  %331 = vmatprep.mubr.bf16.mxu0 (!%p190_p10), %v637_v0  ;;  %548 = vset.pattern.permute.xlu0 (!%p190_p10), %v637_v0  ;;  %s224_s23 = sand.u32 (!%p190_p10), 1, %s619_s18  }
  0x12   : > { %s473_s25 = sshll.u32 (!%p190_p10), %s224_s23, 3  ;;  %s490_s27 = sshll.u32 (!%p190_p10), %s627_s20, 7 }
  0x13   : > { %s738_s8 = scalar_lea.hbm (!%p190_p10), %s789_s4, %s490_s27 }
  0x16   : > { %p238_p12 = scmp.lt.s32.totalorder (!%p190_p10), %s237_s30, 2 }
  0x18   : > { %s229_s5 = scalar_select %p228_p11, %s627_s20, 1 }
  0x19   : > { %s800_s30 = smov (!%p238_p12, %s237_s30), 2  ;;  %s638_s20 = smov [#allocation4]  }
  0x1a   : > { %s491_s6 = smul.u32 40, %s229_s5  ;;  %s476_s10 = sshll.u32 %s800_s30, 2 }
  0x1b   : > { %s247_s13 = scalar_lea.vmem %s788_s3, %s476_s10  ;;  %s475_s14 = sshll.u32 %s800_s30, 1 }
  0x1c   : > { %s235_s9 = scalar_lea.vmem %s786_s1, %s491_s6  ;;  %v257_v8 = vld [vmem:[%s247_s13] sm:$0xf]  ;;  %s241_s0 = scalar_lea.vmem %s787_s2, %s475_s14 }
  0x1d   : > { %v549_v1 = vld [vmem:[%s235_s9 + $0x4] ss:$8 sps:$4 sm:$0xff]   ;;  %v551_v2 = vld [vmem:[%s235_s9] ss:$8 sps:$4 sm:$0xff]   ;;  %v552_v3 = vld [vmem:[%s235_s9 + $0x14] ss:$8 sps:$4 sm:$0xff]   ;;  %260 = vperm.xlu0 %548, %v257_v8  }
  0x1e   : > { %299 = vmatprep.subr.bf16.mxu0 %v549_v1  ;;  %v256_v4 = vld [vmem:[%s235_s9 + $0x20] sm:$0x33]  ;;  %v554_v5 = vld [vmem:[%s235_s9 + $0x10] ss:$8 sps:$4 sm:$0xff]   ;;  %s226_s30 = scalar_lea.vmem [#allocation4], %s473_s25  ;;  %s346_s9 = scalar_lea.sflag [#allocation5], %s224_s23 }
  0x1f   : > { %300 = vmatpush1.bf16.msra.mxu0 %v551_v2  ;;  %v482_v6 = vcombine.high %v256_v4, %v256_v4  ;;  %v481_v7 = vcombine.low %v256_v4, %v256_v4  ;;  %v251_v10 = vld [vmem:[%s241_s0] sm:$0x3]  ;;  %s362_s5 = sshll.u32 %s226_s30, 4  ;;  %s561_s11 = sshll.u32 %s638_s20, 4  ;;  %s740_s5 = int_to_ptr.vmem [resolvable:$true] %s362_s5  ;;  %s562_s11 = int_to_ptr.vmem [resolvable:$false] %s561_s11 }
  0x20   : > { %301 = vmatprep.subr.bf16.mxu0 %v552_v3  ;;  %s557_s10 = scalar_lea.vmem %s740_s5, 128  ;;  %s563_s12 = scalar_lea.vmem %s562_s11, 256 }
  0x21   : > { %v294_v9 = vsel %vm292_vm0, %v481_v7, 0  ;;  %p558_p13 = scmp.ne.s32.totalorder %s740_s5, %s557_s10  ;;  %p564_p2 = scmp.lt.s32.totalorder %s740_s5, %s562_s11 }
  0x22   : > { %p565_p3 = scmp.lt.s32.totalorder %s563_s12, %s557_s10 }
  0x23   : > { %302 = vmatpush1.bf16.msra.mxu0 %v554_v5  ;;  %p559_p0 = pnand %p558_p13, %p707_p4 }
  0x24   : > { %483 = vmatprep.subr.msk.bf16.mxu0 %vm292_vm0, %v482_v6  ;;  %p566_p5 = por %p565_p3, %p564_p2 }
  0x25   : > { %p560_p1 = pneg %p559_p0 }
  0x27   : > { %304 = vmatpush1.bf16.msra.mxu0 %v294_v9  ;;  %p567_p6 = pnand %p566_p5, %p560_p1 }
  0x2a   : > { %484 = vmatmul.mubr.msk.bf16.vlgmr.msra.gmra.mrb[0].mxu0 %vm288_vm1, %v251_v10 }
  0x9c   : > { %v261_v11 = vpop.permute.xlu0 %260 }
  0xfd   : > { %v333_v12 = vpop.f32.mrb[0].mxu0 }
  0xfe   : > { %v334_v13 = vadd.f32 %v333_v12, %v261_v11  ;;  %v335_v14 = vpop.f32.mrb[1].mxu0 }
  0xff   : > { %v336_v15 = vadd.f32 %v335_v14, %v261_v11  ;;  %v337_v16 = vpop.f32.mrb[2].mxu0 }
 0x100   : > { %v338_v17 = vpop.f32.mrb[3].mxu0 }
 0x101   : > { %v342_v18 = vcombine.low %v334_v13, %v336_v15 }
 0x103   : > { %344 = vst [vmem:[%s226_s30] sm:$0xff] %v342_v18 }
 0x104   : > { %570 = shalt.err (!%p567_p6)
}
 0x105   : > { %s571_s13 = scalar_lea.hbm %s738_s8, 128  ;;  %s575_s16 = scalar_lea.hbm %s789_s4, 256 }
 0x106   : > { %p572_p7 = scmp.ne.s32.totalorder %s738_s8, %s571_s13  ;;  %p576_p11 = scmp.lt.u32.totalorder %s738_s8, %s789_s4 }
 0x107   : > { %p577_p12 = scmp.lt.u32.totalorder %s575_s16, %s571_s13  ;;  %p579_p0 = scmp.lt.u32.totalorder %s571_s13, %s738_s8 }
 0x108   : > { %p573_p9 = pnand %p572_p7, %p707_p4 }
 0x109   : > { %p578_p13 = por %p577_p12, %p576_p11 }
 0x10a   : > { %p574_p10 = pneg %p573_p9 }
 0x10b   : > { %p580_p1 = por %p579_p0, %p578_p13 }
 0x10d   : > { %p581_p2 = pnand %p580_p1, %p574_p10 }
 0x10f   : > { %584 = shalt.err (!%p581_p2)
}
 0x110   : > { %492 = dma.vmem_to_hbm [thread:$0]  (%p707_p4), %s740_s5, 128, %s738_s8, %s346_s9  }
 0x111 PF: > { %p498_p3 = scmp.ge.s32.totalorder %s635_s22, 2  ;;  %s374_s25 = sand.u32 1, %s615_s17  }
 0x112   : > { %s375_s27 = scalar_lea.sflag [#allocation5], %s374_s25 }
 0x113   : > { %p495_p5 = pnand %p498_p3, %p714_p8 }
 0x115   : > { %610 = dma.done.wait (!%p495_p5), %s375_s27, 128  }
 0x116   : > { %612 = vsyncadd (!%p495_p5), %s375_s27, 4294967168  ;;  %s18_s22 = sadd.s32 1, %s635_s22   ;;  %s792_s17 = smov %s619_s18 }
 0x117   : > { %p15_p6 = scmp.ge.s32.totalorder %s18_s22, 4   ;;  %s793_s18 = smov %s623_s19 }
 0x118   : > { %s794_s19 = smov %s720_s29  ;;  %s795_s20 = smov %s631_s21 }
 0x119   : > { %s796_s21 = smov %s798_s24  ;;  %17 = sbr.rel (!%p15_p6) target bundleno = 6 (0x6), region = 73 }
 0x120   :  { %380 = vsyncpa [#allocation5], 1 }
 0x121   :  { %382 = vsyncpa [#allocation5 + $0x1], 1 }

</bundles_post_ra>
